<compile_context>
chip_gen: v7x
topology: tpu7x:2x2x1
jax: 0.10.0
libtpu: 0.0.40
codegen_flags: <defaults>
</compile_context>

<pallas_src>
import jax
import jax.numpy as jnp
from jax.experimental import pallas as pl
from jax.experimental.pallas import tpu as pltpu


_LANE = 128
_SUBLANE = 8


def _round_up(x, m):
    return ((x + m - 1) // m) * m


def _net_kernel(x_ref, w1_ref, b1_ref, w2_ref, b2_ref, out_ref):
    # One batch tile per grid step; weights/biases use a constant index_map so they stay
    # VMEM-resident while activation tiles stream through with auto double-buffering.
    a = out_ref.shape[1]                                                      # true num_actions
    x = x_ref[...]                                                            # (TB, S)
    h = jnp.dot(x, w1_ref[...], preferred_element_type=jnp.float32) + b1_ref[...]  # (TB, Hp) f32
    h = jnp.maximum(h, 0.0)                                                   # ReLU in f32
    h = h.astype(w2_ref.dtype)                                                # bf16 MXU path if enabled
    y = jnp.dot(h, w2_ref[...], preferred_element_type=jnp.float32) + b2_ref[...]  # (TB, Ap) f32
    # Lane-dense compute, but store only the useful columns to the unpadded HBM output.
    out_ref[...] = y[:, :a].astype(out_ref.dtype)


def prepare_params(w1, b1, w2, b2, *, compute_dtype=jnp.float32):
    """Pad (hidden/action dims -> 128 lanes) and cast the Net parameters ONCE at init time.

    w1: (num_states, 100)     -- transpose of PyTorch fc1.weight
    b1: (100,) or (1, 100)
    w2: (100, num_actions)    -- transpose of PyTorch fc2.weight
    b2: (num_actions,) or (1, num_actions)

    Zero padding is mathematically neutral: padded hidden units have zero weight and zero
    bias (relu(0)=0 contributes nothing), padded output columns are never stored.
    compute_dtype=jnp.bfloat16 feeds bf16 to the MXU (f32 accumulate) for v6e/v7x.
    """
    S, H = w1.shape
    A = w2.shape[1]
    Hp = _round_up(H, _LANE)
    Ap = _round_up(A, _LANE)

    w1p = jnp.pad(jnp.asarray(w1, compute_dtype), ((0, 0), (0, Hp - H)))
    w2p = jnp.pad(jnp.asarray(w2, compute_dtype), ((0, Hp - H), (0, Ap - A)))
    b1p = jnp.pad(jnp.asarray(b1, jnp.float32).reshape(1, H), ((0, 0), (0, Hp - H)))
    b2p = jnp.pad(jnp.asarray(b2, jnp.float32).reshape(1, A), ((0, 0), (0, Ap - A)))
    return {
        "w1": w1p, "b1": b1p, "w2": w2p, "b2": b2p,
        "num_states": S, "num_actions": A,
        "compute_dtype": compute_dtype,
    }


def net_forward(x, params, *, block_b=4096, min_grid_steps=2):
    """Forward pass of Net.

    x:      (B, num_states) float32
    params: output of prepare_params()
    Returns (B, num_actions) float32.
    """
    B, S = x.shape
    A = params["num_actions"]
    w1p, b1p, w2p, b2p = params["w1"], params["b1"], params["w2"], params["b2"]
    Hp = w1p.shape[1]
    Ap = w2p.shape[1]
    compute_dtype = params["compute_dtype"]

    # Batch tiling:
    #  * tiny batches (<= 8 rows): single whole-array block, no padding / no output slice.
    #  * otherwise: pad only to a multiple of 8, split into >= min_grid_steps tiles (so the
    #    "parallel" axis can use both TensorCores on v7x), each tile at most block_b rows.
    if B <= _SUBLANE:
        Bp, TB, steps = B, B, 1
    else:
        bp8 = _round_up(B, _SUBLANE)
        steps = max(pl.cdiv(bp8, block_b), min_grid_steps)
        TB = _round_up(pl.cdiv(bp8, steps), _SUBLANE)
        steps = pl.cdiv(bp8, TB)
        Bp = steps * TB

    xd = x.astype(compute_dtype)
    xp = xd if Bp == B else jnp.pad(xd, ((0, Bp - B), (0, 0)))

    itemsize = jnp.dtype(compute_dtype).itemsize
    cost = pl.CostEstimate(
        flops=2 * Bp * (S * Hp + Hp * Ap),
        transcendentals=0,
        bytes_accessed=(Bp * S * itemsize            # activation read
                        + Bp * A * 4                 # output write (unpadded)
                        + (S * Hp + Hp * Ap) * itemsize  # weights
                        + (Hp + Ap) * 4),            # biases
    )

    out = pl.pallas_call(
        _net_kernel,
        out_shape=jax.ShapeDtypeStruct((Bp, A), jnp.float32),
        grid_spec=pl.GridSpec(
            grid=(steps,),
            in_specs=[
                pl.BlockSpec((TB, S), lambda i: (i, 0)),    # activation tiles stream over batch
                pl.BlockSpec((S, Hp), lambda i: (0, 0)),    # weights: VMEM-resident
                pl.BlockSpec((1, Hp), lambda i: (0, 0)),
                pl.BlockSpec((Hp, Ap), lambda i: (0, 0)),
                pl.BlockSpec((1, Ap), lambda i: (0, 0)),
            ],
            out_specs=pl.BlockSpec((TB, A), lambda i: (i, 0)),
        ),
        compiler_params=pltpu.CompilerParams(
            dimension_semantics=("parallel",)),             # dual-TC sharding on v7x; harmless elsewhere
        cost_estimate=cost,
    )(xp, w1p, b1p, w2p, b2p)

    return out if Bp == B else out[:B]


if __name__ == "__main__":
    # Small shapes implied by the module: num_states=16, hidden=100, num_actions=4, batch=2.
    B, NUM_STATES, HIDDEN, NUM_ACTIONS = 2, 16, 100, 4

    key = jax.random.PRNGKey(0)
    k_x, k_w1, k_b1, k_w2, k_b2 = jax.random.split(key, 5)

    x = jax.random.normal(k_x, (B, NUM_STATES), dtype=jnp.float32)

    # Deterministic parameter init mirroring the module:
    # weights ~ N(0, 0.1) (as in .normal_(0, 0.1)); biases use default-Linear-style uniform.
    w1 = 0.1 * jax.random.normal(k_w1, (NUM_STATES, HIDDEN), dtype=jnp.float32)
    b1 = jax.random.uniform(k_b1, (HIDDEN,), dtype=jnp.float32,
                            minval=-1.0 / float(NUM_STATES ** 0.5),
                            maxval=1.0 / float(NUM_STATES ** 0.5))
    w2 = 0.1 * jax.random.normal(k_w2, (HIDDEN, NUM_ACTIONS), dtype=jnp.float32)
    b2 = jax.random.uniform(k_b2, (NUM_ACTIONS,), dtype=jnp.float32,
                            minval=-1.0 / float(HIDDEN ** 0.5),
                            maxval=1.0 / float(HIDDEN ** 0.5))

    # Pad/cast the parameters once (f32 default = bit-matches the PyTorch module).
    params = prepare_params(w1, b1, w2, b2)

    def ref_fn(xv):
        return jnp.maximum(xv @ w1 + b1, 0.0) @ w2 + b2

    # Tiny-batch path (single unpadded block).
    out = net_forward(x, params)
    out = jax.block_until_ready(out)
    assert out.shape == (B, NUM_ACTIONS)
    assert jnp.allclose(out, ref_fn(x), atol=1e-5, rtol=1e-5)

    # Larger batch exercises the padded, multi-step (dual-TC) path.
    xb = jax.random.normal(jax.random.PRNGKey(1), (100, NUM_STATES), dtype=jnp.float32)
    outb = jax.block_until_ready(net_forward(xb, params))
    assert outb.shape == (100, NUM_ACTIONS)
    assert jnp.allclose(outb, ref_fn(xb), atol=1e-5, rtol=1e-5)

    print("KERNEL_OK")
</pallas_src>

<mosaic_0001>
module attributes {stable_mosaic.version = 11 : i64} {
  func.func @_net_kernel(%arg0: i32, %arg1: memref<2x16xf32, #tpu.memory_space<vmem>>, %arg2: memref<16x128xf32, #tpu.memory_space<vmem>>, %arg3: memref<1x128xf32, #tpu.memory_space<vmem>>, %arg4: memref<128x128xf32, #tpu.memory_space<vmem>>, %arg5: memref<1x128xf32, #tpu.memory_space<vmem>>, %arg6: memref<2x4xf32, #tpu.memory_space<vmem>>) attributes {dimension_semantics = [#tpu.dimension_semantics<parallel>], iteration_bounds = array<i64: 1>, scalar_prefetch = 0 : i64, scratch_operands = 0 : i64, tpu.core_type = #tpu.core_type<tc>, window_params = [{transform_indices = @transform_0, window_bounds = array<i64: 2, 16>}, {pipeline_mode = #tpu.pipeline_mode<synchronous>, transform_indices = @transform_1, window_bounds = array<i64: 16, 128>}, {pipeline_mode = #tpu.pipeline_mode<synchronous>, transform_indices = @transform_2, window_bounds = array<i64: 1, 128>}, {pipeline_mode = #tpu.pipeline_mode<synchronous>, transform_indices = @transform_3, window_bounds = array<i64: 128, 128>}, {pipeline_mode = #tpu.pipeline_mode<synchronous>, transform_indices = @transform_4, window_bounds = array<i64: 1, 128>}, {transform_indices = @transform_5, window_bounds = array<i64: 2, 4>}]} {
    %c0 = arith.constant 0 : index
    %c0_0 = arith.constant 0 : index
    %0 = vector.load %arg1[%c0, %c0_0] : memref<2x16xf32, #tpu.memory_space<vmem>>, vector<2x16xf32>
    %c0_1 = arith.constant 0 : index
    %c0_2 = arith.constant 0 : index
    %1 = vector.load %arg2[%c0_1, %c0_2] : memref<16x128xf32, #tpu.memory_space<vmem>>, vector<16x128xf32>
    %cst = arith.constant dense<0.000000e+00> : vector<2x128xf32>
    %2 = tpu.matmul %0, %1, %cst {dimension_numbers = #tpu.dot_dimension_numbers<[1], [0], [0], [1], [0, 0, 1, 1], [], []>} : vector<2x16xf32>, vector<16x128xf32>, vector<2x128xf32> -> vector<2x128xf32>
    %c0_3 = arith.constant 0 : index
    %c0_4 = arith.constant 0 : index
    %3 = vector.load %arg3[%c0_3, %c0_4] : memref<1x128xf32, #tpu.memory_space<vmem>>, vector<1x128xf32>
    %4 = vector.broadcast %3 : vector<1x128xf32> to vector<2x128xf32>
    %5 = arith.addf %2, %4 : vector<2x128xf32>
    %cst_5 = arith.constant 0.000000e+00 : f32
    %6 = vector.broadcast %cst_5 : f32 to vector<2x128xf32>
    %7 = arith.maximumf %5, %6 : vector<2x128xf32>
    %c0_6 = arith.constant 0 : index
    %c0_7 = arith.constant 0 : index
    %8 = vector.load %arg4[%c0_6, %c0_7] : memref<128x128xf32, #tpu.memory_space<vmem>>, vector<128x128xf32>
    %cst_8 = arith.constant dense<0.000000e+00> : vector<2x128xf32>
    %9 = tpu.matmul %7, %8, %cst_8 {dimension_numbers = #tpu.dot_dimension_numbers<[1], [0], [0], [1], [0, 0, 1, 1], [], []>} : vector<2x128xf32>, vector<128x128xf32>, vector<2x128xf32> -> vector<2x128xf32>
    %c0_9 = arith.constant 0 : index
    %c0_10 = arith.constant 0 : index
    %10 = vector.load %arg5[%c0_9, %c0_10] : memref<1x128xf32, #tpu.memory_space<vmem>>, vector<1x128xf32>
    %11 = vector.broadcast %10 : vector<1x128xf32> to vector<2x128xf32>
    %12 = arith.addf %9, %11 : vector<2x128xf32>
    %13 = vector.extract_strided_slice %12 {offsets = [0, 0], sizes = [2, 4], strides = [1, 1]} : vector<2x128xf32> to vector<2x4xf32>
    %c0_11 = arith.constant 0 : index
    %c0_12 = arith.constant 0 : index
    %14 = vector.load %arg6[%c0_11, %c0_12] : memref<2x4xf32, #tpu.memory_space<vmem>>, vector<2x4xf32>
    tpu.vector_store %arg6[%c0_11, %c0_12], %13 {strides = array<i32>} : memref<2x4xf32, #tpu.memory_space<vmem>>, vector<2x4xf32>,
    return
  }
  func.func @transform_0(%arg0: i32) -> (i32, i32) {
    %c0_i32 = arith.constant 0 : i32
    %c0_i32_0 = arith.constant 0 : i32
    return %arg0, %c0_i32 : i32, i32
  }
  func.func @transform_1(%arg0: i32) -> (i32, i32) {
    %c0_i32 = arith.constant 0 : i32
    %c0_i32_0 = arith.constant 0 : i32
    %c0_i32_1 = arith.constant 0 : i32
    return %c0_i32, %c0_i32_0 : i32, i32
  }
  func.func @transform_2(%arg0: i32) -> (i32, i32) {
    %c0_i32 = arith.constant 0 : i32
    %c0_i32_0 = arith.constant 0 : i32
    %c0_i32_1 = arith.constant 0 : i32
    return %c0_i32, %c0_i32_0 : i32, i32
  }
  func.func @transform_3(%arg0: i32) -> (i32, i32) {
    %c0_i32 = arith.constant 0 : i32
    %c0_i32_0 = arith.constant 0 : i32
    %c0_i32_1 = arith.constant 0 : i32
    return %c0_i32, %c0_i32_0 : i32, i32
  }
  func.func @transform_4(%arg0: i32) -> (i32, i32) {
    %c0_i32 = arith.constant 0 : i32
    %c0_i32_0 = arith.constant 0 : i32
    %c0_i32_1 = arith.constant 0 : i32
    return %c0_i32, %c0_i32_0 : i32, i32
  }
  func.func @transform_5(%arg0: i32) -> (i32, i32) {
    %c0_i32 = arith.constant 0 : i32
    %c0_i32_0 = arith.constant 0 : i32
    return %arg0, %c0_i32 : i32, i32
  }
}

</mosaic_0001>

<bundles_post_ra>
// kernel: tpu_custom_call.1
= control target key start
LH: loop header
LB: loop body
LE: loop exit
PB: predicated region body
PF: predicated region fallthrough
CT: control target
= control target key end

     0   :  { %10 = vsyncpa [#allocation3], 0  ;;  %s550_s0 = inlined_call_operand.hbm [shape: f32[2,16], index: 0, kind: input, shape index: {}]   ;;  %s551_s1 = inlined_call_operand.hbm [shape: f32[16,128], index: 1, kind: input, shape index: {}]   ;;  %s552_s2 = inlined_call_operand.vmem [shape: f32[1,128], index: 2, kind: input, shape index: {}]   ;;  %s553_s3 = inlined_call_operand.hbm [shape: f32[128,128], index: 3, kind: input, shape index: {}]   ;;  %s554_s4 = inlined_call_operand.vmem [shape: f32[1,128], index: 4, kind: input, shape index: {}]   ;;  %s555_s5 = inlined_call_operand.hbm [shape: f32[2,4], index: 5, kind: output, shape index: {}]  }
   0x1   :  { %11 = vsyncpa [#allocation6], 0 }
   0x2   :  { %12 = vsyncpa [#allocation4], 0  ;;  %s451_s18 = smov [#allocation5]   ;;  %s357_s22 = scalar_lea.hbm %s551_s1, 256 }
   0x3   :  { %s28_s19 = sshll.u32 %s451_s18, 4  ;;  %p358_p0 = scmp.ne.s32.totalorder %s551_s1, %s357_s22  ;;  %s29_s19 = int_to_ptr.vmem [resolvable:$true] %s28_s19 }
   0x4   :  { %p361_p1 = scmp.lt.u32.totalorder %s357_s22, %s551_s1 }
   0x6   :  { %p363_p2 = pnand %p361_p1, %p358_p0 }
   0x8   :  { %366 = shalt.err (!%p363_p2)
}
   0x9   :  { %s367_s27 = scalar_lea.vmem %s29_s19, 256  ;;  %p372_p4 = scmp.lt.s32.totalorder %s29_s19, %s29_s19 }
   0xa   :  { %p368_p3 = scmp.ne.s32.totalorder %s29_s19, %s367_s27  ;;  %p373_p5 = scmp.lt.s32.totalorder %s367_s27, %s367_s27 }
   0xc   :  { %p374_p6 = por %p373_p5, %p372_p4 }
   0xe   :  { %p375_p7 = pnand %p374_p6, %p368_p3 }
  0x10   :  { %378 = shalt.err (!%p375_p7)
}
  0x11   :  { %s452_s28 = smov 128   ;;  %s453_s29 = smov 8  }
  0x12   :  { %34 = dma.hbm_to_vmem [thread:$0]  %s551_s1, 256, %s29_s19, [#allocation6], %s452_s28, %s452_s28, %s453_s29  }
  0x13   :  { %s454_s7 = smov [#allocation2]   ;;  %s455_s9 = smov [#allocation7]  }
  0x14   :  { %s19_s8 = sshll.u32 %s454_s7, 4  ;;  %s42_s10 = sshll.u32 %s455_s9, 4  ;;  %s20_s8 = int_to_ptr.vmem [resolvable:$true] %s19_s8  ;;  %s43_s10 = int_to_ptr.vmem [resolvable:$true] %s42_s10 }
  0x15   :  { %s379_s13 = scalar_lea.hbm %s550_s0, 32 }
  0x16   :  { %p380_p8 = scmp.ne.s32.totalorder %s550_s0, %s379_s13  ;;  %p383_p9 = scmp.lt.u32.totalorder %s379_s13, %s550_s0 }
  0x18   :  { %p385_p10 = pnand %p383_p9, %p380_p8 }
  0x1a   :  { %388 = shalt.err (!%p385_p10)
}
  0x1b   :  { %s389_s1 = scalar_lea.vmem %s20_s8, 32  ;;  %p394_p12 = scmp.lt.s32.totalorder %s20_s8, %s20_s8 }
  0x1c   :  { %p390_p11 = scmp.ne.s32.totalorder %s20_s8, %s389_s1  ;;  %p395_p13 = scmp.lt.s32.totalorder %s389_s1, %s389_s1 }
  0x1e   :  { %p396_p0 = por %p395_p13, %p394_p12 }
  0x20   :  { %p397_p1 = pnand %p396_p0, %p390_p11 }
  0x22   :  { %400 = shalt.err (!%p397_p1)
}
  0x23   :  { %22 = dma.hbm_to_vmem [thread:$0]  %s550_s0, 32, %s20_s8, [#allocation3]  }
  0x24   :  { %s401_s22 = scalar_lea.hbm %s553_s3, 2048 }
  0x25   :  { %p402_p2 = scmp.ne.s32.totalorder %s553_s3, %s401_s22  ;;  %p405_p3 = scmp.lt.u32.totalorder %s401_s22, %s553_s3 }
  0x27   :  { %p407_p4 = pnand %p405_p3, %p402_p2 }
  0x29   :  { %410 = shalt.err (!%p407_p4)
}
  0x2a   :  { %s411_s27 = scalar_lea.vmem %s43_s10, 2048  ;;  %p416_p6 = scmp.lt.s32.totalorder %s43_s10, %s43_s10 }
  0x2b   :  { %p412_p5 = scmp.ne.s32.totalorder %s43_s10, %s411_s27  ;;  %p417_p7 = scmp.lt.s32.totalorder %s411_s27, %s411_s27 }
  0x2d   :  { %p418_p8 = por %p417_p7, %p416_p6 }
  0x2f   :  { %p419_p9 = pnand %p418_p8, %p412_p5 }
  0x31   :  { %422 = shalt.err (!%p419_p9)
}
  0x32   :  { %48 = dma.hbm_to_vmem [thread:$0]  %s553_s3, 2048, %s43_s10, [#allocation6], %s452_s28, %s452_s28, %s453_s29  }
  0x33   :  { %445 = dma.done.wait [#allocation3], 32  }
  0x34   :  { %446 = vsyncadd [#allocation3], 4294967264 }
  0x35   :  { %447 = dma.done.wait [#allocation6], 2304  }
  0x36   :  { %448 = vsyncadd [#allocation6], 4294964992  ;;  %v456_v0 = vmov 0.0|0.0   ;;  %vm457_vm0 = vmmov 0   ;;  %v458_v1 = vmov 0.0   ;;  %v61_v2 = vld [vmem:[#allocation5] sm:$0xff] }
  0x37   :  { %321 = vmatprep.subr.bf16.mxu0 %v456_v0  ;;  %283 = vmatprep.mubr.msk.f32.mxu0 %vm457_vm0, %v458_v1  ;;  %v62_v3 = vld [vmem:[#allocation5 + $0x8] sm:$0xff]  ;;  %v145_v5 = vld [vmem:[#allocation7] sm:$0xff]  ;;  %v146_v6 = vld [vmem:[#allocation7 + $0x8] sm:$0xff]  ;;  %vm70_vm1 = vcmask 130048   ;;  %s459_s7 = smov [#allocation8]   ;;  %vm238_vm2 = vcmask 25600  }
  0x38   :  { %324 = vmatprep.subr.bf16.mxu1 %v456_v0  ;;  %318 = vmatprep.mubr.msk.f32.mxu1 %vm457_vm0, %v458_v1  ;;  %v322_v4 = vpack.c.bf16 %v62_v3, %v61_v2  ;;  %v147_v7 = vld [vmem:[#allocation7 + $0x10] sm:$0xff]  ;;  %v325_v8 = vpack.c.bf16 %v146_v6, %v145_v5  ;;  %v148_v9 = vld [vmem:[#allocation7 + $0x18] sm:$0xff]  ;;  %v60_v10 = vld [vmem:[#allocation2] sm:$0x3]  ;;  %s246_s8 = sshll.u32 %s459_s7, 4  ;;  %s247_s8 = int_to_ptr.vmem [resolvable:$true] %s246_s8 }
  0x39   :  { %v328_v11 = vpack.c.bf16 %v148_v9, %v147_v7  ;;  %v149_v12 = vld [vmem:[#allocation7 + $0x20] sm:$0xff]  ;;  %v150_v13 = vld [vmem:[#allocation7 + $0x28] sm:$0xff]  ;;  %v151_v15 = vld [vmem:[#allocation7 + $0x30] sm:$0xff]  ;;  %s423_s9 = scalar_lea.vmem %s247_s8, 32  ;;  %p428_p11 = scmp.lt.s32.totalorder %s247_s8, %s247_s8 }
  0x3a   :  { %323 = vmatpush3.bf16.msra.mxu0 %v322_v4  ;;  %326 = vmatpush3.bf16.msra.mxu1 %v325_v8  ;;  %v331_v14 = vpack.c.bf16 %v150_v13, %v149_v12  ;;  %v152_v16 = vld [vmem:[#allocation7 + $0x38] sm:$0xff]  ;;  %v153_v18 = vld [vmem:[#allocation7 + $0x40] sm:$0xff]  ;;  %v154_v19 = vld [vmem:[#allocation7 + $0x48] sm:$0xff]  ;;  %p424_p10 = scmp.ne.s32.totalorder %s247_s8, %s423_s9  ;;  %p429_p12 = scmp.lt.s32.totalorder %s423_s9, %s423_s9 }
  0x3b   :  { %327 = vmatprep.subr.bf16.mxu1 %v456_v0  ;;  %v334_v17 = vpack.c.bf16 %v152_v16, %v151_v15  ;;  %v337_v20 = vpack.c.bf16 %v154_v19, %v153_v18  ;;  %v155_v21 = vld [vmem:[#allocation7 + $0x50] sm:$0xff]  ;;  %v156_v22 = vld [vmem:[#allocation7 + $0x58] sm:$0xff]  ;;  %v157_v24 = vld [vmem:[#allocation7 + $0x60] sm:$0xff] }
  0x3c   :  { %v340_v23 = vpack.c.bf16 %v156_v22, %v155_v21  ;;  %v158_v25 = vld [vmem:[#allocation7 + $0x68] sm:$0xff]  ;;  %v159_v27 = vld [vmem:[#allocation7 + $0x70] sm:$0xff]  ;;  %v160_v28 = vld [vmem:[#allocation7 + $0x78] sm:$0xff]  ;;  %p430_p13 = por %p429_p12, %p428_p11 }
  0x3d   :  { %284 = vmatmul.mubr.msk.f32.vlgmr.msra.gmra.mrb[0].mxu0 %vm70_vm1, %v60_v10  ;;  %v343_v26 = vpack.c.bf16 %v158_v25, %v157_v24  ;;  %v346_v29 = vpack.c.bf16 %v160_v28, %v159_v27  ;;  %v256_v30 = vld [vmem:[%s552_s2] ss:$0 sm:$0xff] }
  0x3e   :  { %329 = vmatpush3.bf16.msra.mxu1 %v328_v11  ;;  %v258_v35 = vld [vmem:[%s554_s4] ss:$0 sm:$0xff]  ;;  %p431_p0 = pnand %p430_p13, %p424_p10 }
  0x3f   :  { %330 = vmatprep.subr.bf16.mxu1 %v456_v0 }
  0x42   :  { %332 = vmatpush3.bf16.msra.mxu1 %v331_v14 }
  0x43   :  { %333 = vmatprep.subr.bf16.mxu1 %v456_v0 }
  0x46   :  { %335 = vmatpush3.bf16.msra.mxu1 %v334_v17 }
  0x47   :  { %336 = vmatprep.subr.bf16.mxu1 %v456_v0 }
  0x4a   :  { %338 = vmatpush3.bf16.msra.mxu1 %v337_v20 }
  0x4b   :  { %339 = vmatprep.subr.bf16.mxu1 %v456_v0 }
  0x4e   :  { %341 = vmatpush3.bf16.msra.mxu1 %v340_v23 }
  0x4f   :  { %342 = vmatprep.subr.bf16.mxu1 %v456_v0 }
  0x52   :  { %344 = vmatpush3.bf16.msra.mxu1 %v343_v26 }
  0x53   :  { %345 = vmatprep.subr.bf16.mxu1 %v456_v0 }
  0x56   :  { %347 = vmatpush3.bf16.msra.mxu1 %v346_v29 }
 0x110   :  { %v140_v31 = vpop.f32.mrb[0].mxu0 }
 0x111   :  { %v141_v32 = vadd.f32 %v256_v30, %v140_v31  ;;  %v285_v33 = vpop.f32.mrb[1].mxu0 }
 0x113   :  { %v144_v34 = vmax.f32 %v141_v32, 0.0 }
 0x115   :  { %319 = vmatmul.mubr.f32.vlgmr.msra.gmra.mrb[0].mxu1 %v144_v34 }
 0x1e8   :  { %v234_v36 = vpop.f32.mrb[0].mxu1 }
 0x1e9   :  { %v235_v37 = vadd.f32 %v258_v35, %v234_v36  ;;  %v320_v38 = vpop.f32.mrb[1].mxu1 }
 0x1eb   :  { %239 = vst.msk [vmem:[#allocation8] sm:$0x3] %vm238_vm2, %v235_v37 }
 0x1ec   :  { %434 = shalt.err (!%p431_p0)
}
 0x1ed   :  { %s435_s11 = scalar_lea.hbm %s555_s5, 32 }
 0x1ee   :  { %p436_p1 = scmp.ne.s32.totalorder %s555_s5, %s435_s11  ;;  %p439_p2 = scmp.lt.u32.totalorder %s435_s11, %s555_s5 }
 0x1f0   :  { %p441_p3 = pnand %p439_p2, %p436_p1 }
 0x1f2   :  { %444 = shalt.err (!%p441_p3)
}
 0x1f3   :  { %249 = dma.vmem_to_hbm [thread:$0]  %s247_s8, 32, %s555_s5, [#allocation4]  }
 0x1f4   :  { %449 = dma.done.wait [#allocation4], 32  }
 0x1f5   :  { %450 = vsyncadd [#allocation4], 4294967264 }
 0x1f6   :  { %253 = vsyncpa [#allocation3], 1 }
 0x1f7   :  { %254 = vsyncpa [#allocation6], 1 }
 0x1f8   :  { %255 = vsyncpa [#allocation4], 1 }

</bundles_post_ra>
